<compile_context>
chip_gen: v5e
topology: v5e:2x2
jax: 0.10.0
libtpu: 0.0.40
codegen_flags: <defaults>
</compile_context>

<pallas_src>
import functools

import jax
import jax.numpy as jnp
from jax.experimental import pallas as pl
from jax.experimental.pallas import tpu as pltpu


def _log_sigmoid(x):
    # stable log(sigmoid(x)) = min(x, 0) - log1p(exp(-|x|))
    return jnp.minimum(x, 0.0) - jnp.log1p(jnp.exp(-jnp.abs(x)))


def _ordinal_kernel(batch, need_mask, tok_ref, table_ref, logsig_ref,
                    loss_ref, logp_ref):
    i = pl.program_id(0)
    tb, s1 = tok_ref.shape            # batch tile, (seq_len + 1 packed rating slot)
    k = table_ref.shape[0]            # V_pad + R_pad

    # Combined one-hot counts over the packed index space:
    #   index < V_pad : token id        -> table column 0 holds w
    #   index >= V_pad: V_pad + rating  -> table columns 1,2 hold b_r / b_{r+1}
    toks = tok_ref[...]                                               # [TB, S+1] i32
    lane_iota = jax.lax.broadcasted_iota(jnp.int32, (tb, k), 1)       # [TB, K]
    counts = jnp.zeros((tb, k), jnp.float32)
    for s in range(s1):                # static unroll; S is small for this model
        counts = counts + (toks[:, s:s + 1] == lane_iota).astype(jnp.float32)

    # Single MXU dot fuses: embedding gather, sum over S, and both boundary lookups.
    hbb = jnp.dot(counts, table_ref[...],
                  preferred_element_type=jnp.float32)                 # [TB, 128]
    hbb_t = jnp.transpose(hbb)                                        # [128, TB] (XLU)
    h = hbb_t[0:1, :]                                                 # [1, TB]
    b_lo = hbb_t[1:2, :]
    b_hi = hbb_t[2:3, :]

    inv_sigma = jnp.exp(-logsig_ref[...])                             # [1,1]; no divides
    z_lo = (h - b_lo) * inv_sigma
    z_hi = (h - b_hi) * inv_sigma
    dz = (b_hi - b_lo) * inv_sigma                                    # = z_lo - z_hi >= 0

    # log(sigmoid(z_lo) - sigmoid(z_hi)) stably:
    #   log_sigmoid(z_lo) + log_sigmoid(-z_hi) + log1p(-exp(-(z_lo - z_hi)))
    # (would be -inf only if b_lo == b_hi, which these buckets never have).
    # TODO(synk): `log_difference` is not defined in the reference snippet; this is
    # the standard ordered-logistic likelihood log(F(z_lo) - F(z_hi)).
    log_p = _log_sigmoid(z_lo) + _log_sigmoid(-z_hi) + jnp.log1p(-jnp.exp(-dz))  # [1, TB]

    if need_mask:   # batch was padded to a multiple of the tile; zero padded columns
        col = i * tb + jax.lax.broadcasted_iota(jnp.int32, (1, tb), 1)
        log_p = jnp.where(col < batch, log_p, 0.0)

    logp_ref[...] = log_p                                             # lane-dense store

    @pl.when(i == 0)
    def _init():
        w_col = table_ref[:, 0:1]                                     # padded rows are 0
        loss_ref[...] = 0.5 * jnp.sum(w_col * w_col, keepdims=True)   # L2 over full table

    # Reference hard-codes the /100 normalizer, independent of batch size.
    loss_ref[...] += -jnp.sum(log_p, axis=1, keepdims=True) / 100.0


def model_forward(w, log_sigma, text, rating, b_r, b_r_plus_1):
    """Replicates Model.forward(text, rating) -> (loss, log_p_comb)."""
    B, S = text.shape
    V = w.shape[0]
    R = b_r.shape[0]

    V_pad = ((V + 127) // 128) * 128
    R_pad = 128
    K = V_pad + R_pad
    C = 128                                  # table lane width (cols 0..2 used)

    if B <= 128:
        TB = ((B + 7) // 8) * 8
        B_pad = TB
    else:                                    # large batches: 128-wide lane-aligned tiles
        TB = 128
        B_pad = ((B + TB - 1) // TB) * TB
    num_tiles = B_pad // TB

    # Pack tokens and (offset) rating into one int32 tile: the last column selects
    # the boundary row V_pad + rating[b] of the packed table.
    tok_aug = jnp.concatenate(
        [text.astype(jnp.int32),
         (rating.astype(jnp.int32) + V_pad)[:, None]], axis=1)        # [B, S+1]
    if B_pad != B:
        tok_aug = jnp.pad(tok_aug, ((0, B_pad - B), (0, 0)))

    # Pack embedding weights and both bucket-boundary vectors into one table.
    # TODO(synk): for very large vocabularies, replace the in-VMEM one-hot/table with
    # a tiled DMA gather and compute the L2 term outside the kernel (VMEM residency).
    table = jnp.zeros((K, C), jnp.float32)
    table = table.at[:V, 0].set(w[:, 0].astype(jnp.float32))
    table = table.at[V_pad:V_pad + R, 1].set(b_r.astype(jnp.float32))
    table = table.at[V_pad:V_pad + R, 2].set(b_r_plus_1.astype(jnp.float32))

    log_sigma_2d = jnp.reshape(log_sigma, (1, 1)).astype(jnp.float32)

    kernel = functools.partial(_ordinal_kernel, B, B_pad != B)

    grid_spec = pltpu.PrefetchScalarGridSpec(
        num_scalar_prefetch=0,
        grid=(num_tiles,),
        in_specs=[
            pl.BlockSpec((TB, S + 1), lambda i: (i, 0)),   # packed tokens+rating
            pl.BlockSpec((K, C), lambda i: (0, 0)),        # packed w / b_r / b_{r+1}
            pl.BlockSpec((1, 1), lambda i: (0, 0)),        # log_sigma
        ],
        out_specs=[
            pl.BlockSpec((1, 1), lambda i: (0, 0)),        # resident loss accumulator
            pl.BlockSpec((1, TB), lambda i: (0, i)),       # lane-dense log_p
        ],
    )

    loss_out, logp_out = pl.pallas_call(
        kernel,
        grid_spec=grid_spec,
        out_shape=(
            jax.ShapeDtypeStruct((1, 1), jnp.float32),
            jax.ShapeDtypeStruct((1, B_pad), jnp.float32),
        ),
        # The loss accumulates across the batch-tile axis -> "arbitrary".  For huge
        # batches one could emit per-tile partial losses instead and mark the axis
        # "parallel" so both v7x TensorCores get work.
        compiler_params=pltpu.CompilerParams(dimension_semantics=("arbitrary",)),
    )(tok_aug, table, log_sigma_2d)

    return loss_out[0, 0], logp_out[0, :B]


if __name__ == "__main__":
    key = jax.random.PRNGKey(0)
    k_w, k_text, k_rating = jax.random.split(key, 3)

    vocab_size = 50
    padding_idx = 1   # torch's uniform_ init overwrites the zeroed padding row anyway
    B, S = 8, 8

    # Parameters (mirroring Model.__init__):
    w = jax.random.uniform(k_w, (vocab_size, 1), jnp.float32, -0.01, 0.01)
    log_sigma = jnp.zeros((1,), jnp.float32)  # torch leaves it uninitialized; fix to 0
    b_r = jnp.array([-4.0, -2.0, 0.0, 2.0, 4.0], jnp.float32)
    b_r_plus_1 = jnp.array([-2.0, 0.0, 2.0, 4.0, 100.0], jnp.float32)

    # Inputs:
    text = jax.random.randint(k_text, (B, S), 0, vocab_size, dtype=jnp.int32)
    rating = jax.random.randint(k_rating, (B,), 0, 5, dtype=jnp.int32)

    loss, log_p = jax.jit(model_forward)(w, log_sigma, text, rating, b_r, b_r_plus_1)
    jax.block_until_ready((loss, log_p))
    assert loss.shape == () and log_p.shape == (B,)

    # Pure-JAX reference (same stable formulation) for a plumbing sanity check.
    h_ref = jnp.sum(jnp.take(w[:, 0], text, axis=0), axis=1)
    sigma_ref = jnp.exp(log_sigma[0])
    blo = jnp.take(b_r, rating)
    bhi = jnp.take(b_r_plus_1, rating)
    zlo, zhi = (h_ref - blo) / sigma_ref, (h_ref - bhi) / sigma_ref
    ref_logp = (_log_sigmoid(zlo) + _log_sigmoid(-zhi)
                + jnp.log1p(-jnp.exp(-(bhi - blo) / sigma_ref)))
    ref_loss = -jnp.sum(ref_logp) / 100.0 + 0.5 * jnp.sum(w * w)

    assert jnp.allclose(loss, ref_loss, rtol=2e-3, atol=2e-3)
    assert jnp.allclose(log_p, ref_logp, rtol=2e-3, atol=2e-3)
    print("KERNEL_OK")
</pallas_src>

<mosaic_0001>
module attributes {stable_mosaic.version = 11 : i64} {
  func.func @_ordinal_kernel(%arg0: i32, %arg1: memref<8x9xi32, #tpu.memory_space<vmem>>, %arg2: memref<256x128xf32, #tpu.memory_space<vmem>>, %arg3: memref<1x1xf32, #tpu.memory_space<vmem>>, %arg4: memref<1x1xf32, #tpu.memory_space<vmem>>, %arg5: memref<1x8xf32, #tpu.memory_space<vmem>>) attributes {dimension_semantics = [#tpu.dimension_semantics<arbitrary>], iteration_bounds = array<i64: 1>, scalar_prefetch = 0 : i64, scratch_operands = 0 : i64, tpu.core_type = #tpu.core_type<tc>, window_params = [{transform_indices = @transform_0, window_bounds = array<i64: 8, 9>}, {pipeline_mode = #tpu.pipeline_mode<synchronous>, transform_indices = @transform_1, window_bounds = array<i64: 256, 128>}, {pipeline_mode = #tpu.pipeline_mode<synchronous>, transform_indices = @transform_2, window_bounds = array<i64: 1, 1>}, {pipeline_mode = #tpu.pipeline_mode<synchronous>, transform_indices = @transform_3, window_bounds = array<i64: 1, 1>}, {transform_indices = @transform_4, window_bounds = array<i64: 1, 8>}]} {
    %c0 = arith.constant 0 : index
    %c0_0 = arith.constant 0 : index
    %0 = vector.load %arg1[%c0, %c0_0] : memref<8x9xi32, #tpu.memory_space<vmem>>, vector<8x9xi32>
    %1 = tpu.iota {dimensions = array<i32: 1>} : vector<8x256xi32>
    %cst = arith.constant 0.000000e+00 : f32
    %2 = vector.broadcast %cst : f32 to vector<8x256xf32>
    %3 = vector.extract_strided_slice %0 {offsets = [0, 0], sizes = [8, 1], strides = [1, 1]} : vector<8x9xi32> to vector<8x1xi32>
    %4 = vector.broadcast %3 : vector<8x1xi32> to vector<8x256xi32>
    %5 = arith.cmpi eq, %4, %1 : vector<8x256xi32>
    %6 = arith.extui %5 : vector<8x256xi1> to vector<8x256xi32>
    %7 = arith.sitofp %6 : vector<8x256xi32> to vector<8x256xf32>
    %8 = arith.addf %2, %7 : vector<8x256xf32>
    %9 = vector.extract_strided_slice %0 {offsets = [0, 1], sizes = [8, 1], strides = [1, 1]} : vector<8x9xi32> to vector<8x1xi32>
    %10 = vector.broadcast %9 : vector<8x1xi32> to vector<8x256xi32>
    %11 = arith.cmpi eq, %10, %1 : vector<8x256xi32>
    %12 = arith.extui %11 : vector<8x256xi1> to vector<8x256xi32>
    %13 = arith.sitofp %12 : vector<8x256xi32> to vector<8x256xf32>
    %14 = arith.addf %8, %13 : vector<8x256xf32>
    %15 = vector.extract_strided_slice %0 {offsets = [0, 2], sizes = [8, 1], strides = [1, 1]} : vector<8x9xi32> to vector<8x1xi32>
    %16 = vector.broadcast %15 : vector<8x1xi32> to vector<8x256xi32>
    %17 = arith.cmpi eq, %16, %1 : vector<8x256xi32>
    %18 = arith.extui %17 : vector<8x256xi1> to vector<8x256xi32>
    %19 = arith.sitofp %18 : vector<8x256xi32> to vector<8x256xf32>
    %20 = arith.addf %14, %19 : vector<8x256xf32>
    %21 = vector.extract_strided_slice %0 {offsets = [0, 3], sizes = [8, 1], strides = [1, 1]} : vector<8x9xi32> to vector<8x1xi32>
    %22 = vector.broadcast %21 : vector<8x1xi32> to vector<8x256xi32>
    %23 = arith.cmpi eq, %22, %1 : vector<8x256xi32>
    %24 = arith.extui %23 : vector<8x256xi1> to vector<8x256xi32>
    %25 = arith.sitofp %24 : vector<8x256xi32> to vector<8x256xf32>
    %26 = arith.addf %20, %25 : vector<8x256xf32>
    %27 = vector.extract_strided_slice %0 {offsets = [0, 4], sizes = [8, 1], strides = [1, 1]} : vector<8x9xi32> to vector<8x1xi32>
    %28 = vector.broadcast %27 : vector<8x1xi32> to vector<8x256xi32>
    %29 = arith.cmpi eq, %28, %1 : vector<8x256xi32>
    %30 = arith.extui %29 : vector<8x256xi1> to vector<8x256xi32>
    %31 = arith.sitofp %30 : vector<8x256xi32> to vector<8x256xf32>
    %32 = arith.addf %26, %31 : vector<8x256xf32>
    %33 = vector.extract_strided_slice %0 {offsets = [0, 5], sizes = [8, 1], strides = [1, 1]} : vector<8x9xi32> to vector<8x1xi32>
    %34 = vector.broadcast %33 : vector<8x1xi32> to vector<8x256xi32>
    %35 = arith.cmpi eq, %34, %1 : vector<8x256xi32>
    %36 = arith.extui %35 : vector<8x256xi1> to vector<8x256xi32>
    %37 = arith.sitofp %36 : vector<8x256xi32> to vector<8x256xf32>
    %38 = arith.addf %32, %37 : vector<8x256xf32>
    %39 = vector.extract_strided_slice %0 {offsets = [0, 6], sizes = [8, 1], strides = [1, 1]} : vector<8x9xi32> to vector<8x1xi32>
    %40 = vector.broadcast %39 : vector<8x1xi32> to vector<8x256xi32>
    %41 = arith.cmpi eq, %40, %1 : vector<8x256xi32>
    %42 = arith.extui %41 : vector<8x256xi1> to vector<8x256xi32>
    %43 = arith.sitofp %42 : vector<8x256xi32> to vector<8x256xf32>
    %44 = arith.addf %38, %43 : vector<8x256xf32>
    %45 = vector.extract_strided_slice %0 {offsets = [0, 7], sizes = [8, 1], strides = [1, 1]} : vector<8x9xi32> to vector<8x1xi32>
    %46 = vector.broadcast %45 : vector<8x1xi32> to vector<8x256xi32>
    %47 = arith.cmpi eq, %46, %1 : vector<8x256xi32>
    %48 = arith.extui %47 : vector<8x256xi1> to vector<8x256xi32>
    %49 = arith.sitofp %48 : vector<8x256xi32> to vector<8x256xf32>
    %50 = arith.addf %44, %49 : vector<8x256xf32>
    %51 = vector.extract_strided_slice %0 {offsets = [0, 8], sizes = [8, 1], strides = [1, 1]} : vector<8x9xi32> to vector<8x1xi32>
    %52 = vector.broadcast %51 : vector<8x1xi32> to vector<8x256xi32>
    %53 = arith.cmpi eq, %52, %1 : vector<8x256xi32>
    %54 = arith.extui %53 : vector<8x256xi1> to vector<8x256xi32>
    %55 = arith.sitofp %54 : vector<8x256xi32> to vector<8x256xf32>
    %56 = arith.addf %50, %55 : vector<8x256xf32>
    %c0_1 = arith.constant 0 : index
    %c0_2 = arith.constant 0 : index
    %57 = vector.load %arg2[%c0_1, %c0_2] : memref<256x128xf32, #tpu.memory_space<vmem>>, vector<256x128xf32>
    %cst_3 = arith.constant dense<0.000000e+00> : vector<8x128xf32>
    %58 = tpu.matmul %56, %57, %cst_3 {dimension_numbers = #tpu.dot_dimension_numbers<[1], [0], [0], [1], [0, 0, 1, 1], [], []>} : vector<8x256xf32>, vector<256x128xf32>, vector<8x128xf32> -> vector<8x128xf32>
    %59 = tpu.transpose %58, [1, 0] : vector<8x128xf32> -> vector<128x8xf32>
    %60 = vector.extract_strided_slice %59 {offsets = [0, 0], sizes = [1, 8], strides = [1, 1]} : vector<128x8xf32> to vector<1x8xf32>
    %61 = vector.extract_strided_slice %59 {offsets = [1, 0], sizes = [1, 8], strides = [1, 1]} : vector<128x8xf32> to vector<1x8xf32>
    %62 = vector.extract_strided_slice %59 {offsets = [2, 0], sizes = [1, 8], strides = [1, 1]} : vector<128x8xf32> to vector<1x8xf32>
    %c0_4 = arith.constant 0 : index
    %c0_5 = arith.constant 0 : index
    %63 = vector.load %arg3[%c0_4, %c0_5] : memref<1x1xf32, #tpu.memory_space<vmem>>, vector<1x1xf32>
    %cst_6 = arith.constant 0.000000e+00 : f32
    %64 = vector.broadcast %cst_6 : f32 to vector<1x1xf32>
    %65 = arith.subf %64, %63 : vector<1x1xf32>
    %66 = math.exp %65 : vector<1x1xf32>
    %67 = arith.subf %60, %61 : vector<1x8xf32>
    %68 = vector.broadcast %66 : vector<1x1xf32> to vector<1x8xf32>
    %69 = arith.mulf %67, %68 : vector<1x8xf32>
    %70 = arith.subf %60, %62 : vector<1x8xf32>
    %71 = vector.broadcast %66 : vector<1x1xf32> to vector<1x8xf32>
    %72 = arith.mulf %70, %71 : vector<1x8xf32>
    %73 = arith.subf %62, %61 : vector<1x8xf32>
    %74 = vector.broadcast %66 : vector<1x1xf32> to vector<1x8xf32>
    %75 = arith.mulf %73, %74 : vector<1x8xf32>
    %cst_7 = arith.constant 0.000000e+00 : f32
    %76 = vector.broadcast %cst_7 : f32 to vector<1x8xf32>
    %77 = arith.minimumf %69, %76 : vector<1x8xf32>
    %78 = math.absf %69 : vector<1x8xf32>
    %cst_8 = arith.constant 0.000000e+00 : f32
    %79 = vector.broadcast %cst_8 : f32 to vector<1x8xf32>
    %80 = arith.subf %79, %78 : vector<1x8xf32>
    %81 = math.exp %80 : vector<1x8xf32>
    %82 = math.log1p %81 : vector<1x8xf32>
    %83 = arith.subf %77, %82 : vector<1x8xf32>
    %cst_9 = arith.constant 0.000000e+00 : f32
    %84 = vector.broadcast %cst_9 : f32 to vector<1x8xf32>
    %85 = arith.subf %84, %72 : vector<1x8xf32>
    %cst_10 = arith.constant 0.000000e+00 : f32
    %86 = vector.broadcast %cst_10 : f32 to vector<1x8xf32>
    %87 = arith.minimumf %85, %86 : vector<1x8xf32>
    %88 = math.absf %85 : vector<1x8xf32>
    %cst_11 = arith.constant 0.000000e+00 : f32
    %89 = vector.broadcast %cst_11 : f32 to vector<1x8xf32>
    %90 = arith.subf %89, %88 : vector<1x8xf32>
    %91 = math.exp %90 : vector<1x8xf32>
    %92 = math.log1p %91 : vector<1x8xf32>
    %93 = arith.subf %87, %92 : vector<1x8xf32>
    %94 = arith.addf %83, %93 : vector<1x8xf32>
    %cst_12 = arith.constant 0.000000e+00 : f32
    %95 = vector.broadcast %cst_12 : f32 to vector<1x8xf32>
    %96 = arith.subf %95, %75 : vector<1x8xf32>
    %97 = math.exp %96 : vector<1x8xf32>
    %cst_13 = arith.constant 0.000000e+00 : f32
    %98 = vector.broadcast %cst_13 : f32 to vector<1x8xf32>
    %99 = arith.subf %98, %97 : vector<1x8xf32>
    %100 = math.log1p %99 : vector<1x8xf32>
    %101 = arith.addf %94, %100 : vector<1x8xf32>
    %c0_14 = arith.constant 0 : index
    %c0_15 = arith.constant 0 : index
    %102 = vector.load %arg5[%c0_14, %c0_15] : memref<1x8xf32, #tpu.memory_space<vmem>>, vector<1x8xf32>
    tpu.vector_store %arg5[%c0_14, %c0_15], %101 {strides = array<i32>} : memref<1x8xf32, #tpu.memory_space<vmem>>, vector<1x8xf32>,
    %c0_i32 = arith.constant 0 : i32
    %103 = arith.cmpi eq, %arg0, %c0_i32 : i32
    %104 = arith.extui %103 : i1 to i32
    %c0_i32_16 = arith.constant 0 : i32
    %105 = arith.cmpi ne, %104, %c0_i32_16 : i32
    scf.if %105 {
      %c0_24 = arith.constant 0 : index
      %c0_25 = arith.constant 0 : index
      %115 = vector.load %arg2[%c0_24, %c0_25] : memref<256x128xf32, #tpu.memory_space<vmem>>, vector<256x1xf32>
      %116 = arith.mulf %115, %115 : vector<256x1xf32>
      %117 = vector.shape_cast %116 : vector<256x1xf32> to vector<1x256x1xf32>
      %cst_26 = arith.constant dense<0.000000e+00> : vector<1xf32>
      %118 = vector.multi_reduction <add>, %117, %cst_26 [1, 2] : vector<1x256x1xf32> to vector<1xf32>
      %119 = vector.shape_cast %118 : vector<1xf32> to vector<1x1x1xf32>
      %120 = vector.extract %119[0, 0, 0] : f32 from vector<1x1x1xf32>
      %121 = vector.broadcast %120 : f32 to vector<1x1xf32>
      %cst_27 = arith.constant 5.000000e-01 : f32
      %122 = vector.broadcast %cst_27 : f32 to vector<1x1xf32>
      %123 = arith.mulf %122, %121 : vector<1x1xf32>
      %c0_28 = arith.constant 0 : index
      %c0_29 = arith.constant 0 : index
      %124 = vector.load %arg4[%c0_28, %c0_29] : memref<1x1xf32, #tpu.memory_space<vmem>>, vector<1x1xf32>
      tpu.vector_store %arg4[%c0_28, %c0_29], %123 {strides = array<i32>} : memref<1x1xf32, #tpu.memory_space<vmem>>, vector<1x1xf32>,
    } else {
    }
    %c0_17 = arith.constant 0 : index
    %c0_18 = arith.constant 0 : index
    %106 = vector.load %arg4[%c0_17, %c0_18] : memref<1x1xf32, #tpu.memory_space<vmem>>, vector<1x1xf32>
    %cst_19 = arith.constant dense<0.000000e+00> : vector<1xf32>
    %107 = vector.multi_reduction <add>, %101, %cst_19 [1] : vector<1x8xf32> to vector<1xf32>
    %108 = vector.shape_cast %107 : vector<1xf32> to vector<1x1xf32>
    %cst_20 = arith.constant 0.000000e+00 : f32
    %109 = vector.broadcast %cst_20 : f32 to vector<1x1xf32>
    %110 = arith.subf %109, %108 : vector<1x1xf32>
    %cst_21 = arith.constant 1.000000e+02 : f32
    %111 = vector.broadcast %cst_21 : f32 to vector<1x1xf32>
    %112 = arith.divf %110, %111 : vector<1x1xf32>
    %113 = arith.addf %106, %112 : vector<1x1xf32>
    %c0_22 = arith.constant 0 : index
    %c0_23 = arith.constant 0 : index
    %114 = vector.load %arg4[%c0_22, %c0_23] : memref<1x1xf32, #tpu.memory_space<vmem>>, vector<1x1xf32>
    tpu.vector_store %arg4[%c0_22, %c0_23], %113 {strides = array<i32>} : memref<1x1xf32, #tpu.memory_space<vmem>>, vector<1x1xf32>,
    return
  }
  func.func @transform_0(%arg0: i32) -> (i32, i32) {
    %c0_i32 = arith.constant 0 : i32
    %c0_i32_0 = arith.constant 0 : i32
    return %arg0, %c0_i32 : i32, i32
  }
  func.func @transform_1(%arg0: i32) -> (i32, i32) {
    %c0_i32 = arith.constant 0 : i32
    %c0_i32_0 = arith.constant 0 : i32
    %c0_i32_1 = arith.constant 0 : i32
    return %c0_i32, %c0_i32_0 : i32, i32
  }
  func.func @transform_2(%arg0: i32) -> (i32, i32) {
    %c0_i32 = arith.constant 0 : i32
    %c0_i32_0 = arith.constant 0 : i32
    %c0_i32_1 = arith.constant 0 : i32
    return %c0_i32, %c0_i32_0 : i32, i32
  }
  func.func @transform_3(%arg0: i32) -> (i32, i32) {
    %c0_i32 = arith.constant 0 : i32
    %c0_i32_0 = arith.constant 0 : i32
    %c0_i32_1 = arith.constant 0 : i32
    return %c0_i32, %c0_i32_0 : i32, i32
  }
  func.func @transform_4(%arg0: i32) -> (i32, i32) {
    %c0_i32 = arith.constant 0 : i32
    %c0_i32_0 = arith.constant 0 : i32
    return %c0_i32, %arg0 : i32, i32
  }
}

</mosaic_0001>

<bundles_post_ra>
// kernel: model_forward.1
= control target key start
LH: loop header
LB: loop body
LE: loop exit
PB: predicated region body
PF: predicated region fallthrough
CT: control target
= control target key end

     0   :  { %s946_s0 = inlined_call_operand.vmem [shape: s32[8,9], index: 0, kind: input, shape index: {}]   ;;  %s947_s1 = inlined_call_operand.vmem [shape: f32[256,128], index: 1, kind: input, shape index: {}]   ;;  %s948_s2 = inlined_call_operand.<no memory space> [shape: f32[1,1], index: 2, kind: input, shape index: {}]   ;;  %s949_s3 = inlined_call_operand.hbm [shape: f32[1,1], index: 3, kind: output, shape index: {0}]   ;;  %s950_s4 = inlined_call_operand.hbm [shape: f32[1,8], index: 4, kind: output, shape index: {1}]  }
   0x1   :  { %v10_v0 = vstv %s948_s2 }
   0x2   :  { %11 = vst [vmem:[#allocation2] sm:$0x1] %v10_v0 }
   0x3   :  { %12 = vsyncpa [#allocation4], 0  ;;  %v20_v1 = vld [vmem:[%s946_s0] sm:$0xff]  ;;  %v653_v2 = vld [vmem:[%s947_s1 + $0x78] sm:$0xff]  ;;  %v606_v3 = vmov 0   ;;  %v607_v4 = vmov 2  }
   0x4   :  { %527 = vset.pattern.permute.xlu0 %v606_v3  ;;  %529 = vset.pattern.permute.xlu1 %v607_v4  ;;  %v658_v5 = vld [vmem:[%s947_s1 + $0xf8] sm:$0xff]  ;;  %v663_v6 = vld [vmem:[%s947_s1 + $0x70] sm:$0xff] }
   0x5   :  { %25 = vperm.xlu0 %527, %v20_v1   ;;  %47 = vperm.xlu1 %529, %v20_v1  }
   0x6   :  { %13 = vsyncpa [#allocation6], 0  ;;  %v608_v7 = vmov 4   ;;  %155 = vmatpush.msra.mxu0 %v653_v2  ;;  %v669_v8 = vld [vmem:[%s947_s1 + $0xf0] sm:$0xff]  ;;  %175 = vmatpush.msra.mxu1 %v658_v5  ;;  %v609_v9 = vmov 1   ;;  %v610_v10 = vmov 3   ;;  %v21_v44 = vlaneseq }
   0x7   :  { %531 = vset.pattern.permute.xlu2 %v608_v7  ;;  %v611_v11 = vmov 5   ;;  %v612_v12 = vmov 6   ;;  %v613_v13 = vmov 8   ;;  %v614_v14 = vmov 7   ;;  %v677_v15 = vld [vmem:[%s947_s1 + $0x68] sm:$0xff]  ;;  %v689_v17 = vld [vmem:[%s947_s1 + $0x60] sm:$0xff] }
   0x8   :  { %69 = vperm.xlu2 %531, %v20_v1   ;;  %156 = vmatpush.msra.mxu0 %v663_v6  ;;  %v682_v16 = vld [vmem:[%s947_s1 + $0xe8] sm:$0xff]  ;;  %v694_v18 = vld [vmem:[%s947_s1 + $0xe0] sm:$0xff]  ;;  %v699_v19 = vld [vmem:[%s947_s1 + $0x58] sm:$0xff]  ;;  %v22_v48 = vand.u32 127, %v21_v44  ;;  %v615_v56 = vmov 0.0   ;;  %s480_s28 = sshll.u32 %s950_s4, 4  ;;  %s481_s28 = int_to_ptr.hbm [resolvable:$true] %s480_s28 }
   0x9   :  { %176 = vmatpush.msra.mxu1 %v669_v8  ;;  %v706_v20 = vld [vmem:[%s947_s1 + $0xd8] sm:$0xff]  ;;  %v711_v21 = vld [vmem:[%s947_s1 + $0x50] sm:$0xff]  ;;  %v723_v23 = vld [vmem:[%s947_s1 + $0x48] sm:$0xff]  ;;  %s618_s4 = smov [#allocation3]   ;;  %s469_s7 = sshll.u32 %s949_s3, 4  ;;  %s470_s7 = int_to_ptr.hbm [resolvable:$true] %s469_s7 }
   0xa   :  { %157 = vmatpush.msra.mxu0 %v677_v15  ;;  %v716_v22 = vld [vmem:[%s947_s1 + $0xd0] sm:$0xff]  ;;  %v728_v24 = vld [vmem:[%s947_s1 + $0xc8] sm:$0xff]  ;;  %v737_v25 = vld [vmem:[%s947_s1 + $0x40] sm:$0xff]  ;;  %v23_v51 = vadd.s32 128, %v22_v48  ;;  %s467_s30 = sshll.u32 %s618_s4, 4  ;;  %s468_s30 = int_to_ptr.vmem [resolvable:$true] %s467_s30 }
   0xb   :  { %177 = vmatpush.msra.mxu1 %v682_v16  ;;  %v742_v26 = vld [vmem:[%s947_s1 + $0xc0] sm:$0xff]  ;;  %v749_v27 = vld [vmem:[%s947_s1 + $0x38] sm:$0xff]  ;;  %v761_v29 = vld [vmem:[%s947_s1 + $0x30] sm:$0xff] }
   0xc   :  { %158 = vmatpush.msra.mxu0 %v689_v17  ;;  %v754_v28 = vld [vmem:[%s947_s1 + $0xb8] sm:$0xff]  ;;  %v766_v30 = vld [vmem:[%s947_s1 + $0xb0] sm:$0xff]  ;;  %v773_v31 = vld [vmem:[%s947_s1 + $0x28] sm:$0xff] }
   0xd   :  { %528 = vset.pattern.permute.xlu0 %v609_v9  ;;  %530 = vset.pattern.permute.xlu1 %v610_v10  ;;  %v778_v32 = vld [vmem:[%s947_s1 + $0xa8] sm:$0xff]  ;;  %v785_v33 = vld [vmem:[%s947_s1 + $0x20] sm:$0xff]  ;;  %v797_v35 = vld [vmem:[%s947_s1 + $0x18] sm:$0xff] }
   0xe   :  { %36 = vperm.xlu0 %528, %v20_v1   ;;  %58 = vperm.xlu1 %530, %v20_v1   ;;  %v790_v34 = vld [vmem:[%s947_s1 + $0xa0] sm:$0xff]  ;;  %v802_v36 = vld [vmem:[%s947_s1 + $0x98] sm:$0xff]  ;;  %v809_v37 = vld [vmem:[%s947_s1 + $0x10] sm:$0xff] }
   0xf   :  { %178 = vmatpush.msra.mxu1 %v694_v18  ;;  %159 = vmatpush.msra.mxu0 %v699_v19  ;;  %v814_v38 = vld [vmem:[%s947_s1 + $0x90] sm:$0xff]  ;;  %v819_v39 = vld [vmem:[%s947_s1 + $0x8] sm:$0xff]  ;;  %v831_v41 = vld [vmem:[%s947_s1] sm:$0xff] }
  0x10   :  { %532 = vset.pattern.permute.xlu2 %v611_v11  ;;  %v826_v40 = vld [vmem:[%s947_s1 + $0x88] sm:$0xff]  ;;  %v836_v42 = vld [vmem:[%s947_s1 + $0x80] sm:$0xff]  ;;  %s616_s1 = smov [#allocation5]  }
  0x11   :  { %80 = vperm.xlu2 %532, %v20_v1   ;;  %179 = vmatpush.msra.mxu1 %v706_v20  ;;  %v227_v45 = vld [vmem:[#allocation2] sm:$0x1]  ;;  %s478_s25 = sshll.u32 %s616_s1, 4  ;;  %s479_s25 = int_to_ptr.vmem [resolvable:$true] %s478_s25 }
  0x12   :  { %160 = vmatpush.msra.mxu0 %v711_v21  ;;  %v228_v46 = vsub.f32 0.0, %v227_v45 }
  0x13   :  { %180 = vmatpush.msra.mxu1 %v716_v22 }
  0x14   :  { %161 = vmatpush.msra.mxu0 %v723_v23  ;;  %v229_v47 = vmul.f32 1.442695, %v228_v46 }
  0x15   :  { %181 = vmatpush.msra.mxu1 %v728_v24 }
  0x16   :  { %533 = vset.pattern.permute.xlu1 %v612_v12  ;;  %535 = vset.pattern.permute.xlu0 %v613_v13  ;;  %538 = vpow2.f32 %v229_v47 }
  0x17   :  { %91 = vperm.xlu1 %533, %v20_v1   ;;  %113 = vperm.xlu0 %535, %v20_v1  }
  0x18   :  { %162 = vmatpush.msra.mxu0 %v737_v25  ;;  %182 = vmatpush.msra.mxu1 %v742_v26 }
  0x19   :  { %534 = vset.pattern.permute.xlu2 %v614_v14 }
  0x1a   :  { %102 = vperm.xlu2 %534, %v20_v1   ;;  %163 = vmatpush.msra.mxu0 %v749_v27 }
  0x1b   :  { %183 = vmatpush.msra.mxu1 %v754_v28 }
  0x1c   :  { %164 = vmatpush.msra.mxu0 %v761_v29  ;;  %v539_v53 = vpop.eup %538 }
  0x1d   :  { %184 = vmatpush.msra.mxu1 %v766_v30 }
  0x1e   :  { %165 = vmatpush.msra.mxu0 %v773_v31 }
  0x1f   :  { %536 = vset.pattern.permute.xlu1 %v606_v3  ;;  %537 = vset.pattern.permute.xlu0 %v606_v3 }
  0x20   :  { %185 = vmatpush.msra.mxu1 %v778_v32  ;;  %166 = vmatpush.msra.mxu0 %v785_v33 }
  0x21   :  { %237 = vperm.xlu1 %536, %v539_v53  }
  0x22   :  { %186 = vmatpush.msra.mxu1 %v790_v34  ;;  %167 = vmatpush.msra.mxu0 %v797_v35 }
  0x24   :  { %187 = vmatpush.msra.mxu1 %v802_v36  ;;  %168 = vmatpush.msra.mxu0 %v809_v37 }
  0x26   :  { %188 = vmatpush.msra.mxu1 %v814_v38  ;;  %169 = vmatpush.msra.mxu0 %v819_v39 }
  0x28   :  { %189 = vmatpush.msra.mxu1 %v826_v40  ;;  %170 = vmatpush.msra.mxu0 %v831_v41 }
  0x2a   :  { %190 = vmatpush.msra.mxu1 %v836_v42 }
  0x62   :  { %v70_v43 = vpop.permute.xlu2 %69 }
  0x63   :  { %vm71_vm8 = vcmp.eq.s32.totalorder %v70_v43, %v22_v48  ;;  %vm72_vm9 = vcmp.eq.s32.totalorder %v70_v43, %v23_v51 }
  0x64   :  { %v502_v12 = vsel %vm71_vm8, 1.0, %v615_v56  ;;  %v503_v13 = vsel %vm72_vm9, 1.0, %v615_v56 }
  0x6b   :  { %v81_v52 = vpop.permute.xlu2 %80 }
  0x6c   :  { %vm82_vm10 = vcmp.eq.s32.totalorder %v81_v52, %v22_v48  ;;  %vm83_vm11 = vcmp.eq.s32.totalorder %v81_v52, %v23_v51 }
  0x6d   :  { %v504_v14 = vsel %vm82_vm10, 1.0, %v615_v56  ;;  %v505_v44 = vsel %vm83_vm11, 1.0, %v615_v56 }
  0x74   :  { %v103_v9 = vpop.permute.xlu2 %102 }
  0x75   :  { %vm104_vm12 = vcmp.eq.s32.totalorder %v103_v9, %v22_v48  ;;  %vm105_vm13 = vcmp.eq.s32.totalorder %v103_v9, %v23_v51 }
  0x77   :  { %v26_v49 = vpop.permute.xlu0 %25  ;;  %v48_v50 = vpop.permute.xlu1 %47 }
  0x78   :  { %vm27_vm0 = vcmp.eq.s32.totalorder %v26_v49, %v22_v48  ;;  %vm28_vm1 = vcmp.eq.s32.totalorder %v26_v49, %v23_v51  ;;  %vm49_vm2 = vcmp.eq.s32.totalorder %v48_v50, %v22_v48  ;;  %vm50_vm3 = vcmp.eq.s32.totalorder %v48_v50, %v23_v51 }
  0x79   :  { %v494_v57 = vsel %vm27_vm0, 1.0, %v615_v56  ;;  %v495_v58 = vsel %vm28_vm1, 1.0, %v615_v56  ;;  %v498_v63 = vsel %vm49_vm2, 1.0, %v615_v56  ;;  %v499_v0 = vsel %vm50_vm3, 1.0, %v615_v56 }
  0x7a   :  { %vm369_vm2 = vcmask 7168  }
  0x80   :  { %v37_v54 = vpop.permute.xlu0 %36  ;;  %v59_v55 = vpop.permute.xlu1 %58 }
  0x81   :  { %vm38_vm4 = vcmp.eq.s32.totalorder %v37_v54, %v22_v48  ;;  %vm39_vm5 = vcmp.eq.s32.totalorder %v37_v54, %v23_v51  ;;  %vm60_vm6 = vcmp.eq.s32.totalorder %v59_v55, %v22_v48  ;;  %vm61_vm7 = vcmp.eq.s32.totalorder %v59_v55, %v23_v51 }
  0x82   :  { %v496_v59 = vsel %vm38_vm4, 1.0, %v615_v56  ;;  %v497_v60 = vsel %vm39_vm5, 1.0, %v615_v56  ;;  %v500_v4 = vsel %vm60_vm6, 1.0, %v615_v56  ;;  %v501_v7 = vsel %vm61_vm7, 1.0, %v615_v56 }
  0x83   :  { %v44_v61 = vadd.f32 %v496_v59, %v494_v57  ;;  %v45_v62 = vadd.f32 %v497_v60, %v495_v58  ;;  %v508_v54 = vsel %vm104_vm12, 1.0, %v615_v56  ;;  %v509_v55 = vsel %vm105_vm13, 1.0, %v615_v56 }
  0x84   :  { %vm299_vm6 = vcmask 57344   ;;  %vm444_vm7 = vcmask 0  }
  0x85   :  { %v55_v1 = vadd.f32 %v498_v63, %v44_v61  ;;  %v56_v3 = vadd.f32 %v499_v0, %v45_v62 }
  0x87   :  { %v66_v10 = vadd.f32 %v500_v4, %v55_v1  ;;  %v67_v11 = vadd.f32 %v501_v7, %v56_v3  ;;  %v339_v1 = vmul.f32 %v809_v37, %v809_v37  ;;  %v340_v3 = vmul.f32 %v797_v35, %v797_v35 }
  0x88   :  { %v343_v35 = vmul.f32 %v761_v29, %v761_v29 }
  0x89   :  { %v77_v45 = vadd.f32 %v502_v12, %v66_v10  ;;  %v78_v46 = vadd.f32 %v503_v13, %v67_v11  ;;  %v92_v47 = vpop.permute.xlu1 %91  ;;  %v114_v49 = vpop.permute.xlu0 %113  ;;  %v373_v9 = vsel %vm369_vm2, %v339_v1, 0.0  ;;  %v375_v10 = vsel %vm369_vm2, %v340_v3, 0.0 }
  0x8a   :  { %vm93_vm14 = vcmp.eq.s32.totalorder %v92_v47, %v22_v48  ;;  %vm94_vm15 = vcmp.eq.s32.totalorder %v92_v47, %v23_v51  ;;  %vm115_vm0 = vcmp.eq.s32.totalorder %v114_v49, %v22_v48  ;;  %vm116_vm1 = vcmp.eq.s32.totalorder %v114_v49, %v23_v51 }
  0x8b   :  { %v88_v43 = vadd.f32 %v504_v14, %v77_v45  ;;  %v89_v50 = vadd.f32 %v505_v44, %v78_v46  ;;  %v506_v52 = vsel %vm93_vm14, 1.0, %v615_v56  ;;  %v507_v53 = vsel %vm94_vm15, 1.0, %v615_v56 }
  0x8c   :  { %v510_v59 = vsel %vm115_vm0, 1.0, %v615_v56  ;;  %v511_v60 = vsel %vm116_vm1, 1.0, %v615_v56  ;;  %v337_v48 = vmul.f32 %v831_v41, %v831_v41  ;;  %v338_v51 = vmul.f32 %v819_v39, %v819_v39 }
  0x8d   :  { %v99_v57 = vadd.f32 %v506_v52, %v88_v43  ;;  %v100_v58 = vadd.f32 %v507_v53, %v89_v50  ;;  %v341_v56 = vmul.f32 %v785_v33, %v785_v33  ;;  %v342_v39 = vmul.f32 %v773_v31, %v773_v31 }
  0x8e   :  { %v370_v4 = vsel %vm369_vm2, %v337_v48, 0.0  ;;  %v371_v7 = vsel %vm369_vm2, %v338_v51, 0.0  ;;  %v344_v33 = vmul.f32 %v749_v27, %v749_v27  ;;  %v345_v44 = vmul.f32 %v737_v25, %v737_v25 }
  0x8f   :  { %v110_v61 = vadd.f32 %v508_v54, %v99_v57  ;;  %v111_v62 = vadd.f32 %v509_v55, %v100_v58  ;;  %v372_v41 = vadd.f32 %v371_v7, %v370_v4  ;;  %v377_v11 = vsel %vm369_vm2, %v341_v56, 0.0 }
  0x90   :  { %v379_v13 = vsel %vm369_vm2, %v342_v39, 0.0  ;;  %v381_v31 = vsel %vm369_vm2, %v343_v35, 0.0  ;;  %v346_v46 = vmul.f32 %v723_v23, %v723_v23  ;;  %v383_v29 = vsel %vm369_vm2, %v344_v33, 0.0 }
  0x91   :  { %v121_v63 = vadd.f32 %v510_v59, %v110_v61  ;;  %v122_v0 = vadd.f32 %v511_v60, %v111_v62  ;;  %v374_v37 = vadd.f32 %v373_v9, %v372_v41  ;;  %v347_v49 = vmul.f32 %v711_v21, %v711_v21 }
  0x92   :  { %v385_v27 = vsel %vm369_vm2, %v345_v44, 0.0  ;;  %v348_v50 = vmul.f32 %v699_v19, %v699_v19  ;;  %v387_v25 = vsel %vm369_vm2, %v346_v46, 0.0  ;;  %v349_v53 = vmul.f32 %v689_v17, %v689_v17 }
  0x93   :  { %171 = vmatmul.f32.vlgmr.msra.gmra.mxu0 %v121_v63  ;;  %191 = vmatmul.f32.vlgmr.msra.gmra.mxu1 %v122_v0  ;;  %v376_v12 = vadd.f32 %v375_v10, %v374_v37  ;;  %v389_v23 = vsel %vm369_vm2, %v347_v49, 0.0  ;;  %v350_v55 = vmul.f32 %v677_v15, %v677_v15  ;;  %v351_v19 = vmul.f32 %v663_v6, %v663_v6 }
  0x94   :  { %v391_v21 = vsel %vm369_vm2, %v348_v50, 0.0  ;;  %v393_v60 = vsel %vm369_vm2, %v349_v53, 0.0  ;;  %v352_v17 = vmul.f32 %v653_v2, %v653_v2  ;;  %v353_v15 = vmul.f32 %v836_v42, %v836_v42 }
  0x95   :  { %v378_v14 = vadd.f32 %v377_v11, %v376_v12  ;;  %v395_v63 = vsel %vm369_vm2, %v350_v55, 0.0  ;;  %v397_v48 = vsel %vm369_vm2, %v351_v19, 0.0  ;;  %v354_v6 = vmul.f32 %v826_v40, %v826_v40 }
  0x96   :  { %v399_v1 = vsel %vm369_vm2, %v352_v17, 0.0  ;;  %v355_v56 = vmul.f32 %v814_v38, %v814_v38  ;;  %v401_v2 = vsel %vm369_vm2, %v353_v15, 0.0  ;;  %v356_v7 = vmul.f32 %v802_v36, %v802_v36 }
  0x97   :  { %v380_v45 = vadd.f32 %v379_v13, %v378_v14  ;;  %v403_v42 = vsel %vm369_vm2, %v354_v6, 0.0  ;;  %v357_v41 = vmul.f32 %v790_v34, %v790_v34  ;;  %v358_v10 = vmul.f32 %v778_v32, %v778_v32 }
  0x98   :  { %v405_v40 = vsel %vm369_vm2, %v355_v56, 0.0  ;;  %v407_v38 = vsel %vm369_vm2, %v356_v7, 0.0  ;;  %v359_v35 = vmul.f32 %v766_v30, %v766_v30  ;;  %v360_v12 = vmul.f32 %v754_v28, %v754_v28 }
  0x99   :  { %v382_v47 = vadd.f32 %v381_v31, %v380_v45  ;;  %v409_v36 = vsel %vm369_vm2, %v357_v41, 0.0  ;;  %v411_v34 = vsel %vm369_vm2, %v358_v10, 0.0  ;;  %v361_v13 = vmul.f32 %v742_v26, %v742_v26 }
  0x9a   :  { %v413_v32 = vsel %vm369_vm2, %v359_v35, 0.0  ;;  %v362_v44 = vmul.f32 %v728_v24, %v728_v24  ;;  %v415_v30 = vsel %vm369_vm2, %v360_v12, 0.0  ;;  %v363_v45 = vmul.f32 %v716_v22, %v716_v22 }
  0x9b   :  { %v384_v43 = vadd.f32 %v383_v29, %v382_v47  ;;  %v417_v28 = vsel %vm369_vm2, %v361_v13, 0.0  ;;  %v364_v29 = vmul.f32 %v706_v20, %v706_v20  ;;  %v365_v49 = vmul.f32 %v694_v18, %v694_v18 }
  0x9c   :  { %v419_v26 = vsel %vm369_vm2, %v362_v44, 0.0  ;;  %v421_v24 = vsel %vm369_vm2, %v363_v45, 0.0  ;;  %v368_v53 = vmul.f32 %v658_v5, %v658_v5 }
  0x9d   :  { %v386_v52 = vadd.f32 %v385_v27, %v384_v43  ;;  %v366_v43 = vmul.f32 %v682_v16, %v682_v16  ;;  %v423_v22 = vsel %vm369_vm2, %v364_v29, 0.0  ;;  %v425_v20 = vsel %vm369_vm2, %v365_v49, 0.0 }
  0x9e   :  { %v431_v16 = vsel %vm369_vm2, %v368_v53, 0.0 }
  0x9f   :  { %v388_v54 = vadd.f32 %v387_v25, %v386_v52  ;;  %v367_v25 = vmul.f32 %v669_v8, %v669_v8  ;;  %v427_v18 = vsel %vm369_vm2, %v366_v43, 0.0 }
  0xa1   :  { %v390_v57 = vadd.f32 %v389_v23, %v388_v54  ;;  %v429_v54 = vsel %vm369_vm2, %v367_v25, 0.0 }
  0xa3   :  { %v392_v62 = vadd.f32 %v391_v21, %v390_v57 }
  0xa5   :  { %v394_v0 = vadd.f32 %v393_v60, %v392_v62 }
  0xa7   :  { %v396_v51 = vadd.f32 %v395_v63, %v394_v0 }
  0xa9   :  { %v398_v3 = vadd.f32 %v397_v48, %v396_v51 }
  0xab   :  { %v400_v4 = vadd.f32 %v399_v1, %v398_v3 }
  0xad   :  { %v402_v9 = vadd.f32 %v401_v2, %v400_v4 }
  0xaf   :  { %v404_v39 = vadd.f32 %v403_v42, %v402_v9 }
  0xb1   :  { %v406_v37 = vadd.f32 %v405_v40, %v404_v39 }
  0xb3   :  { %v408_v11 = vadd.f32 %v407_v38, %v406_v37 }
  0xb5   :  { %v410_v33 = vadd.f32 %v409_v36, %v408_v11 }
  0xb7   :  { %v412_v14 = vadd.f32 %v411_v34, %v410_v33 }
  0xb9   :  { %v414_v31 = vadd.f32 %v413_v32, %v412_v14 }
  0xbb   :  { %v416_v46 = vadd.f32 %v415_v30, %v414_v31 }
  0xbd   :  { %v418_v47 = vadd.f32 %v417_v28, %v416_v46 }
  0xbf   :  { %v420_v27 = vadd.f32 %v419_v26, %v418_v47 }
  0xc1   :  { %v422_v50 = vadd.f32 %v421_v24, %v420_v27 }
  0xc3   :  { %v424_v52 = vadd.f32 %v423_v22, %v422_v50 }
  0xc5   :  { %v426_v23 = vadd.f32 %v425_v20, %v424_v52 }
  0xc7   :  { %v428_v55 = vadd.f32 %v427_v18, %v426_v23 }
  0xc9   :  { %v430_v21 = vadd.f32 %v429_v54, %v428_v55 }
  0xcb   :  { %v432_v57 = vadd.f32 %v431_v16, %v430_v21 }
  0xcd   :  { %433 = vadd.xlane.f32.xlu2 %v432_v57 }
 0x110   :  { %v172_v58 = vpop.f32.mrf.mxu0  ;;  %v192_v59 = vpop.f32.mrf.mxu1 }
 0x111   :  { %v193_v61 = vadd.f32 %v192_v59, %v172_v58  ;;  %v238_v58 = vpop.permute.xlu1 %237 }
 0x113   :  { %195 = vxpose.xlu1.b32.start.end [1/1] (short) (narrow) %v193_v61, 8  ;;  %v240_v61 = vperm.slane %v238_v58, 0 }
 0x140   :  { %v434_v2 = vpop.xlane.xlu2 %433 }
 0x141   :  { %v435_v4 = vrot.slane %v434_v2, 4 }
 0x143   :  { %v436_v9 = vadd.f32 %v435_v4, %v434_v2 }
 0x145   :  { %v437_v40 = vrot.slane %v436_v9, 2 }
 0x147   :  { %v438_v39 = vadd.f32 %v437_v40, %v436_v9 }
 0x149   :  { %v439_v37 = vrot.slane %v438_v39, 1 }
 0x14b   :  { %v440_v33 = vadd.f32 %v439_v37, %v438_v39 }
 0x14d   :  { %512 = vpush %v440_v33 }
 0x17e   :  { %s513_s29 = spop %512 }
 0x17f   :  { %v442_v58 = vstv %s513_s29 }
 0x1b7   :  { %v211_v59 = vpop.trf.xlu1 }
 0x1b8   :  { %v232_v8 = vrot.slane %v211_v59, 1  ;;  %v242_v19 = vrot.slane %v211_v59, 2  ;;  %v246_v60 = vrot.slane %v211_v59, 7 }
 0x1ba   :  { %v234_v62 = vsub.f32 %v211_v59, %v232_v8  ;;  %v244_v17 = vsub.f32 %v211_v59, %v242_v19  ;;  %v248_v5 = vsub.f32 %v211_v59, %v246_v60  ;;  %v443_v59 = vmul.f32 0.5, %v442_v58 }
 0x1bb   :  { %v617_v8 = vmov 100.0  }
 0x1bc   :  { %v245_v63 = vmul.f32 %v244_v17, %v240_v61  ;;  %v249_v0 = vmul.f32 %v248_v5, %v240_v61  ;;  %v241_v15 = vmul.f32 %v240_v61, %v234_v62  ;;  %445 = vst.msk [vmem:[#allocation3] sm:$0x1] %vm444_vm7, %v443_v59 }
 0x1be   :  { %v282_v48 = vsub.f32 0.0, %v249_v0  ;;  %v251_v51 = vand.u32 2147483647, %v241_v15  ;;  %v265_v6 = vsub.f32 0.0, %v245_v63  ;;  %v250_v20 = vmin.f32 %v241_v15, 0.0 }
 0x1c0   :  { %v283_v1 = vmul.f32 1.442695, %v282_v48  ;;  %v252_v3 = vsub.f32 0.0, %v251_v51  ;;  %v267_v56 = vand.u32 2147483647, %v265_v6  ;;  %v266_v52 = vmin.f32 %v265_v6, 0.0 }
 0x1c2   :  { %540 = vpow2.f32 %v283_v1  ;;  %v253_v7 = vmul.f32 1.442695, %v252_v3  ;;  %v268_v42 = vsub.f32 0.0, %v267_v56 }
 0x1c3   :  { %v446_v48 = vld [vmem:[#allocation3] sm:$0x1] }
 0x1c4   :  { %542 = vpow2.f32 %v253_v7  ;;  %v269_v41 = vmul.f32 1.442695, %v268_v42 }
 0x1c6   :  { %544 = vpow2.f32 %v269_v41 }
 0x1c8   :  { %v541_v10 = vpop.eup %540 }
 0x1c9   :  { %v285_v38 = vsub.f32 0.0, %v541_v10 }
 0x1ca   :  { %v543_v35 = vpop.eup %542 }
 0x1cb   :  { %v255_v36 = vadd.f32 1.0, %v543_v35  ;;  %v286_v11 = vadd.f32 1.0, %v285_v38  ;;  %v258_v34 = vmul.f32 -0.5, %v543_v35  ;;  %v289_v14 = vmul.f32 -0.5, %v285_v38 }
 0x1cc   :  { %v545_v12 = vpop.eup %544  ;;  %v261_v30 = vand.u32 2147483647, %v543_v35  ;;  %v292_v29 = vand.u32 2147483647, %v285_v38 }
 0x1cd   :  { %546 = vlog2.f32 %v255_v36  ;;  %v271_v13 = vadd.f32 1.0, %v545_v12  ;;  %v274_v32 = vmul.f32 -0.5, %v545_v12  ;;  %v259_v44 = vadd.f32 1.0, %v258_v34 }
 0x1ce   :  { %548 = vlog2.f32 %v286_v11  ;;  %v290_v45 = vadd.f32 1.0, %v289_v14  ;;  %v277_v46 = vand.u32 2147483647, %v545_v12  ;;  %vm262_vm3 = vcmp.lt.f32.partialorder %v261_v30, 0.0004427343 }
 0x1cf   :  { %550 = vlog2.f32 %v271_v13  ;;  %v275_v31 = vadd.f32 1.0, %v274_v32  ;;  %v260_v49 = vmul.f32 %v543_v35, %v259_v44  ;;  %vm293_vm5 = vcmp.lt.f32.partialorder %v292_v29, 0.0004427343 }
 0x1d0   :  { %v291_v25 = vmul.f32 %v290_v45, %v285_v38  ;;  %vm278_vm4 = vcmp.lt.f32.partialorder %v277_v46, 0.0004427343  ;;  %552 = vrcp.f32 %v617_v8 }
 0x1d1   :  { %v276_v50 = vmul.f32 %v545_v12, %v275_v31 }
 0x1d3   :  { %v547_v28 = vpop.eup %546 }
 0x1d4   :  { %v549_v26 = vpop.eup %548  ;;  %v257_v47 = vmul.f32 0.6931472, %v547_v28 }
 0x1d5   :  { %v551_v24 = vpop.eup %550  ;;  %v288_v27 = vmul.f32 0.6931472, %v549_v26 }
 0x1d6   :  { %v263_v43 = vsel %vm262_vm3, %v260_v49, %v257_v47  ;;  %v273_v22 = vmul.f32 0.6931472, %v551_v24  ;;  %v553_v19 = vpop.eup %552 }
 0x1d7   :  { %v294_v18 = vsel %vm293_vm5, %v291_v25, %v288_v27  ;;  %v264_v23 = vsub.f32 %v250_v20, %v263_v43  ;;  %v452_v60 = vmul.f32 100.0, %v553_v19  ;;  %vm456_vm8 = vweird.f32 %v553_v19 }
 0x1d8   :  { %v279_v53 = vsel %vm278_vm4, %v276_v50, %v273_v22  ;;  %v296_v16 = vrot.slane %v294_v18, 2 }
 0x1d9   :  { %v280_v54 = vsub.f32 %v266_v52, %v279_v53  ;;  %v453_v61 = vsub.f32 1.0, %v452_v60 }
 0x1db   :  { %v281_v55 = vadd.f32 %v280_v54, %v264_v23  ;;  %v454_v62 = vmul.f32 %v553_v19, %v453_v61 }
 0x1dd   :  { %v298_v21 = vadd.f32 %v296_v16, %v281_v55  ;;  %v455_v17 = vadd.f32 %v553_v19, %v454_v62 }
 0x1df   :  { %v447_v57 = vsel %vm299_vm6, %v298_v21, 0.0  ;;  %300 = vst.msk [vmem:[#allocation5] sm:$0x1] %vm299_vm6, %v298_v21  ;;  %v457_v5 = vsel %vm456_vm8, %v553_v19, %v455_v17 }
 0x1e0   :  { %448 = vadd.xlane.f32.xlu0 %v447_v57  ;;  %483 = dma.vmem_to_hbm [thread:$0]  %s479_s25, 16, %s481_s28, [#allocation6]  }
 0x253   :  { %v449_v63 = vpop.xlane.xlu0 %448 }
 0x254   :  { %v450_v0 = vsub.f32 0.0, %v449_v63 }
 0x256   :  { %v458_v15 = vmul.f32 %v457_v5, %v450_v0 }
 0x258   :  { %v459_v51 = vadd.f32 %v458_v15, %v446_v48 }
 0x25a   :  { %461 = vst.msk [vmem:[#allocation3] sm:$0x1] %vm444_vm7, %v459_v51 }
 0x25b   :  { %472 = dma.vmem_to_hbm [thread:$0]  %s468_s30, 16, %s470_s7, [#allocation4]  }
 0x25c   :  { %602 = dma.done.wait [#allocation4], 16  }
 0x25d   :  { %603 = vsyncadd [#allocation4], 4294967280 }
 0x25e   :  { %604 = dma.done.wait [#allocation6], 16  }
 0x25f   :  { %605 = vsyncadd [#allocation6], 4294967280 }
 0x260   :  { %492 = vsyncpa [#allocation4], 1 }
 0x261   :  { %493 = vsyncpa [#allocation6], 1 }

</bundles_post_ra>
